<compile_context>
chip_gen: v7x
topology: tpu7x:2x2x1
jax: 0.10.0
libtpu: 0.0.40
codegen_flags: <defaults>
</compile_context>

<pallas_src>
import jax
import jax.numpy as jnp
from jax.experimental import pallas as pl
from jax.experimental.pallas import tpu as pltpu


def _round_up(x, m):
    return ((x + m - 1) // m) * m


def _graph_encoder_kernel(a_ref, pa_ref, x_ref,
                          w1_ref, b1_ref, w2_ref, b2_ref, wl_ref, bl_ref,
                          out_ref, xw1_scr, acc_scr):
    i = pl.program_id(0)

    @pl.when(i == 0)
    def _init():
        # Hoisted projection X @ W1: computed once, reused by every row tile.
        xw1_scr[...] = jnp.dot(
            x_ref[...], w1_ref[...],
            preferred_element_type=jnp.float32).astype(jnp.bfloat16)
        acc_scr[...] = jnp.zeros_like(acc_scr)

    # conv1 for this tile of node rows: H1_tile = relu(A_tile @ (X W1) + b1)
    h1 = jnp.dot(a_ref[...], xw1_scr[...],
                 preferred_element_type=jnp.float32) + b1_ref[...]
    h1 = jnp.maximum(h1, 0.0)

    # Fused conv2 + mean pool: pooled = (P @ A_hat) @ H1 @ W2 + b2.
    # Per tile we accumulate PA[:, tile] @ H1_tile into a tiny [G, d_h] acc.
    acc_scr[...] += jnp.dot(pa_ref[...], h1.astype(jnp.bfloat16),
                            preferred_element_type=jnp.float32)

    @pl.when(i == pl.num_programs(0) - 1)
    def _finalize():
        pooled = jnp.dot(acc_scr[...], w2_ref[...],
                         preferred_element_type=jnp.float32) + b2_ref[...]
        out_ref[...] = (jnp.dot(pooled, wl_ref[...],
                                preferred_element_type=jnp.float32)
                        + bl_ref[...]).astype(out_ref.dtype)


def simple_graph_encoder(x, a_hat, pool, params, *, tm=256):
    """x: [N, d_v] f32, a_hat: [N, N] f32, pool: [G, N] f32 (mean-pool matrix)."""
    w1, b1, w2, b2, wl, bl = params
    N, d_v = x.shape
    G = pool.shape[0]
    d_h = w1.shape[1]
    out_dim = wl.shape[1]

    f32, bf16 = jnp.float32, jnp.bfloat16

    # Padding: rows of A to the tile size, feature dims to 128 lanes.
    n_pad = _round_up(N, tm)
    dv_pad = _round_up(d_v, 128)
    dh_pad = _round_up(d_h, 128)
    out_pad = _round_up(out_dim, 128)
    g_pad = _round_up(max(G, 8), 8)

    def pad2(a, r, c, dt):
        buf = jnp.zeros((r, c), dt)
        return buf.at[:a.shape[0], :a.shape[1]].set(a.astype(dt))

    # Fuse the mean pool with conv2's propagation (valid because P rows sum to 1).
    pa = jnp.dot(pool, a_hat)

    a_p = pad2(a_hat, n_pad, n_pad, bf16)
    pa_p = pad2(pa, g_pad, n_pad, bf16)
    x_p = pad2(x, n_pad, dv_pad, bf16)
    w1_p = pad2(w1, dv_pad, dh_pad, bf16)
    b1_p = pad2(b1, 1, dh_pad, f32)
    w2_p = pad2(w2, dh_pad, dh_pad, f32)
    b2_p = pad2(b2, 1, dh_pad, f32)
    wl_p = pad2(wl, dh_pad, out_pad, f32)
    bl_p = pad2(bl, 1, out_pad, f32)

    grid = (n_pad // tm,)
    const = lambda i: (0, 0)

    in_specs = [
        pl.BlockSpec((tm, n_pad), lambda i: (i, 0)),   # A_hat: streamed row tiles
        pl.BlockSpec((g_pad, tm), lambda i: (0, i)),   # PA: matching column tiles
        pl.BlockSpec((n_pad, dv_pad), const),          # X   (resident, used once)
        pl.BlockSpec((dv_pad, dh_pad), const),         # W1
        pl.BlockSpec((1, dh_pad), const),              # b1
        pl.BlockSpec((dh_pad, dh_pad), const),         # W2
        pl.BlockSpec((1, dh_pad), const),              # b2
        pl.BlockSpec((dh_pad, out_pad), const),        # Wl
        pl.BlockSpec((1, out_pad), const),             # bl
    ]
    out_specs = pl.BlockSpec((g_pad, out_pad), const)

    scratch_shapes = [
        pltpu.VMEM((n_pad, dh_pad), bf16),   # XW1, resident across all tiles
        pltpu.VMEM((g_pad, dh_pad), f32),    # pooled-H1 accumulator
    ]

    # VMEM budget: double-buffered streamed operands + resident scratch + weights.
    vmem_bytes = (2 * tm * n_pad * 2 + 2 * g_pad * tm * 2
                  + 2 * n_pad * dv_pad * 2
                  + n_pad * dh_pad * 2 + g_pad * dh_pad * 4
                  + 2 * g_pad * out_pad * 4
                  + dv_pad * dh_pad * 2 + dh_pad * dh_pad * 4
                  + dh_pad * out_pad * 4 + 3 * dh_pad * 4 + out_pad * 4)
    vmem_limit = int(min(max(2 * vmem_bytes, 32 * 1024 * 1024),
                         64 * 1024 * 1024))

    flops = (2 * n_pad * dv_pad * dh_pad          # X @ W1 (once)
             + 2 * n_pad * n_pad * dh_pad         # A_hat @ XW1
             + 2 * g_pad * n_pad * dh_pad         # PA @ H1
             + 2 * g_pad * dh_pad * dh_pad        # @ W2
             + 2 * g_pad * dh_pad * out_pad)      # @ Wl
    bytes_accessed = (n_pad * n_pad * 2 + g_pad * n_pad * 2
                      + n_pad * dv_pad * 2 + dv_pad * dh_pad * 2
                      + dh_pad * dh_pad * 4 + dh_pad * out_pad * 4
                      + 3 * dh_pad * 4 + out_pad * 4 + g_pad * out_pad * 4)

    out_padded = pl.pallas_call(
        _graph_encoder_kernel,
        out_shape=jax.ShapeDtypeStruct((g_pad, out_pad), f32),
        grid_spec=pltpu.PrefetchScalarGridSpec(
            num_scalar_prefetch=0,
            grid=grid,
            in_specs=in_specs,
            out_specs=out_specs,
            scratch_shapes=scratch_shapes),
        compiler_params=pltpu.CompilerParams(
            dimension_semantics=("arbitrary",),   # row-tile axis is a reduction
            vmem_limit_bytes=vmem_limit),
        cost_estimate=pl.CostEstimate(flops=flops, transcendentals=0,
                                      bytes_accessed=bytes_accessed),
    )(a_p, pa_p, x_p, w1_p, b1_p, w2_p, b2_p, wl_p, bl_p)

    return out_padded[:G, :out_dim]


def build_gcn_norm_adj(edge_index, num_nodes):
    """Dense equivalent of PyG gcn_norm with self-loops.

    edge_index: [2, E] int32 (row=source, col=target).
    Returns A_hat[target, source] = deg[t]^-1/2 * deg[s]^-1/2 over (A + I).
    """
    src, dst = edge_index[0], edge_index[1]
    A = jnp.zeros((num_nodes, num_nodes), jnp.float32)
    A = A.at[dst, src].add(1.0)                      # message source -> target
    A = A + jnp.eye(num_nodes, dtype=jnp.float32)    # self-loops
    deg = A.sum(axis=1)                              # in-degree incl. self-loop
    dinv = jnp.where(deg > 0, 1.0 / jnp.sqrt(deg), 0.0)
    return dinv[:, None] * A * dinv[None, :]


def build_mean_pool(batch, num_graphs, num_nodes):
    """batch: [N] int32 graph id per node -> P [G, N] with 1/|graph_g| entries."""
    onehot = (batch[None, :] == jnp.arange(num_graphs)[:, None]).astype(jnp.float32)
    counts = onehot.sum(axis=1, keepdims=True)
    return onehot / jnp.maximum(counts, 1.0)


def init_params(key, d_v, d_h, output_dim):
    ks = jax.random.split(key, 6)

    def uni(k, shape, fan_in):
        bound = 1.0 / jnp.sqrt(jnp.float32(fan_in))
        return jax.random.uniform(k, shape, jnp.float32, -bound, bound)

    w1 = uni(ks[0], (d_v, d_h), d_v)
    b1 = uni(ks[1], (1, d_h), d_v)
    w2 = uni(ks[2], (d_h, d_h), d_h)
    b2 = uni(ks[3], (1, d_h), d_h)
    wl = uni(ks[4], (d_h, output_dim), d_h)
    bl = uni(ks[5], (1, output_dim), d_h)
    return (w1, b1, w2, b2, wl, bl)


def reference_forward(x, a_hat, pool, params):
    """Pure-JAX f32 reference matching the PyTorch module."""
    w1, b1, w2, b2, wl, bl = params
    h1 = jnp.maximum(a_hat @ (x @ w1) + b1, 0.0)
    h2 = a_hat @ (h1 @ w2) + b2
    pooled = pool @ h2
    return pooled @ wl + bl


if __name__ == "__main__":
    key = jax.random.PRNGKey(0)
    d_v, d_h, output_dim = 8, 32, 16
    num_nodes, num_graphs, num_edges = 32, 2, 64

    k_x, k_e, k_p = jax.random.split(key, 3)

    # Node features.
    x = jax.random.normal(k_x, (num_nodes, d_v), jnp.float32)

    # Random directed edges (kept within each graph's node range).
    half = num_nodes // num_graphs
    e0 = jax.random.randint(jax.random.fold_in(k_e, 0), (num_edges // 2,), 0, half)
    e1 = jax.random.randint(jax.random.fold_in(k_e, 1), (num_edges // 2,), 0, half)
    e2 = jax.random.randint(jax.random.fold_in(k_e, 2), (num_edges // 2,), half, num_nodes)
    e3 = jax.random.randint(jax.random.fold_in(k_e, 3), (num_edges // 2,), half, num_nodes)
    edge_index = jnp.stack([jnp.concatenate([e0, e2]),
                            jnp.concatenate([e1, e3])]).astype(jnp.int32)

    # Graph assignment: first half of nodes -> graph 0, second half -> graph 1.
    batch = jnp.concatenate([jnp.zeros((half,), jnp.int32),
                             jnp.ones((num_nodes - half,), jnp.int32)])

    # Glue (plain JAX): normalized adjacency and mean-pool matrix.
    a_hat = build_gcn_norm_adj(edge_index, num_nodes)
    pool = build_mean_pool(batch, num_graphs, num_nodes)

    params = init_params(k_p, d_v, d_h, output_dim)

    out = simple_graph_encoder(x, a_hat, pool, params)
    out = jax.block_until_ready(out)

    assert out.shape == (num_graphs, output_dim)
    assert jnp.all(jnp.isfinite(out))

    # Loose tolerance: kernel streams A_hat / X / W1 in bf16.
    ref = reference_forward(x, a_hat, pool, params)
    assert jnp.allclose(out, ref, atol=1e-1, rtol=1e-1)

    print("KERNEL_OK")
</pallas_src>

<mosaic_0001>
module attributes {stable_mosaic.version = 11 : i64} {
  func.func @_graph_encoder_kernel(%arg0: i32, %arg1: memref<256x256xbf16, #tpu.memory_space<vmem>>, %arg2: memref<8x256xbf16, #tpu.memory_space<vmem>>, %arg3: memref<256x128xbf16, #tpu.memory_space<vmem>>, %arg4: memref<128x128xbf16, #tpu.memory_space<vmem>>, %arg5: memref<1x128xf32, #tpu.memory_space<vmem>>, %arg6: memref<128x128xf32, #tpu.memory_space<vmem>>, %arg7: memref<1x128xf32, #tpu.memory_space<vmem>>, %arg8: memref<128x128xf32, #tpu.memory_space<vmem>>, %arg9: memref<1x128xf32, #tpu.memory_space<vmem>>, %arg10: memref<8x128xf32, #tpu.memory_space<vmem>>, %arg11: memref<256x128xbf16, #tpu.memory_space<vmem>>, %arg12: memref<8x128xf32, #tpu.memory_space<vmem>>) attributes {dimension_semantics = [#tpu.dimension_semantics<arbitrary>], iteration_bounds = array<i64: 1>, scalar_prefetch = 0 : i64, scratch_operands = 2 : i64, tpu.core_type = #tpu.core_type<tc>, window_params = [{transform_indices = @transform_0, window_bounds = array<i64: 256, 256>}, {transform_indices = @transform_1, window_bounds = array<i64: 8, 256>}, {pipeline_mode = #tpu.pipeline_mode<synchronous>, transform_indices = @transform_2, window_bounds = array<i64: 256, 128>}, {pipeline_mode = #tpu.pipeline_mode<synchronous>, transform_indices = @transform_3, window_bounds = array<i64: 128, 128>}, {pipeline_mode = #tpu.pipeline_mode<synchronous>, transform_indices = @transform_4, window_bounds = array<i64: 1, 128>}, {pipeline_mode = #tpu.pipeline_mode<synchronous>, transform_indices = @transform_5, window_bounds = array<i64: 128, 128>}, {pipeline_mode = #tpu.pipeline_mode<synchronous>, transform_indices = @transform_6, window_bounds = array<i64: 1, 128>}, {pipeline_mode = #tpu.pipeline_mode<synchronous>, transform_indices = @transform_7, window_bounds = array<i64: 128, 128>}, {pipeline_mode = #tpu.pipeline_mode<synchronous>, transform_indices = @transform_8, window_bounds = array<i64: 1, 128>}, {pipeline_mode = #tpu.pipeline_mode<synchronous>, transform_indices = @transform_9, window_bounds = array<i64: 8, 128>}]} {
    %c0_i32 = arith.constant 0 : i32
    %0 = arith.cmpi eq, %arg0, %c0_i32 : i32
    %1 = arith.extui %0 : i1 to i32
    %c0_i32_0 = arith.constant 0 : i32
    %2 = arith.cmpi ne, %1, %c0_i32_0 : i32
    scf.if %2 {
      %c0_16 = arith.constant 0 : index
      %c0_17 = arith.constant 0 : index
      %20 = vector.load %arg3[%c0_16, %c0_17] : memref<256x128xbf16, #tpu.memory_space<vmem>>, vector<256x128xbf16>
      %c0_18 = arith.constant 0 : index
      %c0_19 = arith.constant 0 : index
      %21 = vector.load %arg4[%c0_18, %c0_19] : memref<128x128xbf16, #tpu.memory_space<vmem>>, vector<128x128xbf16>
      %cst_20 = arith.constant dense<0.000000e+00> : vector<256x128xf32>
      %22 = tpu.matmul %20, %21, %cst_20 {dimension_numbers = #tpu.dot_dimension_numbers<[1], [0], [0], [1], [0, 0, 1, 1], [], []>} : vector<256x128xbf16>, vector<128x128xbf16>, vector<256x128xf32> -> vector<256x128xf32>
      %23 = arith.truncf %22 : vector<256x128xf32> to vector<256x128xbf16>
      %c0_21 = arith.constant 0 : index
      %c0_22 = arith.constant 0 : index
      %24 = vector.load %arg11[%c0_21, %c0_22] : memref<256x128xbf16, #tpu.memory_space<vmem>>, vector<256x128xbf16>
      tpu.vector_store %arg11[%c0_21, %c0_22], %23 {strides = array<i32>} : memref<256x128xbf16, #tpu.memory_space<vmem>>, vector<256x128xbf16>,
      %cst_23 = arith.constant 0.000000e+00 : f32
      %25 = vector.broadcast %cst_23 : f32 to vector<8x128xf32>
      %c0_24 = arith.constant 0 : index
      %c0_25 = arith.constant 0 : index
      %26 = vector.load %arg12[%c0_24, %c0_25] : memref<8x128xf32, #tpu.memory_space<vmem>>, vector<8x128xf32>
      tpu.vector_store %arg12[%c0_24, %c0_25], %25 {strides = array<i32>} : memref<8x128xf32, #tpu.memory_space<vmem>>, vector<8x128xf32>,
    } else {
    }
    %c0 = arith.constant 0 : index
    %c0_1 = arith.constant 0 : index
    %3 = vector.load %arg1[%c0, %c0_1] : memref<256x256xbf16, #tpu.memory_space<vmem>>, vector<256x256xbf16>
    %c0_2 = arith.constant 0 : index
    %c0_3 = arith.constant 0 : index
    %4 = vector.load %arg11[%c0_2, %c0_3] : memref<256x128xbf16, #tpu.memory_space<vmem>>, vector<256x128xbf16>
    %cst = arith.constant dense<0.000000e+00> : vector<256x128xf32>
    %5 = tpu.matmul %3, %4, %cst {dimension_numbers = #tpu.dot_dimension_numbers<[1], [0], [0], [1], [0, 0, 1, 1], [], []>} : vector<256x256xbf16>, vector<256x128xbf16>, vector<256x128xf32> -> vector<256x128xf32>
    %c0_4 = arith.constant 0 : index
    %c0_5 = arith.constant 0 : index
    %6 = vector.load %arg5[%c0_4, %c0_5] : memref<1x128xf32, #tpu.memory_space<vmem>>, vector<1x128xf32>
    %7 = vector.broadcast %6 : vector<1x128xf32> to vector<256x128xf32>
    %8 = arith.addf %5, %7 : vector<256x128xf32>
    %cst_6 = arith.constant 0.000000e+00 : f32
    %9 = vector.broadcast %cst_6 : f32 to vector<256x128xf32>
    %10 = arith.maximumf %8, %9 : vector<256x128xf32>
    %c0_7 = arith.constant 0 : index
    %c0_8 = arith.constant 0 : index
    %11 = vector.load %arg12[%c0_7, %c0_8] : memref<8x128xf32, #tpu.memory_space<vmem>>, vector<8x128xf32>
    %c0_9 = arith.constant 0 : index
    %c0_10 = arith.constant 0 : index
    %12 = vector.load %arg2[%c0_9, %c0_10] : memref<8x256xbf16, #tpu.memory_space<vmem>>, vector<8x256xbf16>
    %13 = arith.truncf %10 : vector<256x128xf32> to vector<256x128xbf16>
    %cst_11 = arith.constant dense<0.000000e+00> : vector<8x128xf32>
    %14 = tpu.matmul %12, %13, %cst_11 {dimension_numbers = #tpu.dot_dimension_numbers<[1], [0], [0], [1], [0, 0, 1, 1], [], []>} : vector<8x256xbf16>, vector<256x128xbf16>, vector<8x128xf32> -> vector<8x128xf32>
    %15 = arith.addf %11, %14 : vector<8x128xf32>
    %c0_12 = arith.constant 0 : index
    %c0_13 = arith.constant 0 : index
    %16 = vector.load %arg12[%c0_12, %c0_13] : memref<8x128xf32, #tpu.memory_space<vmem>>, vector<8x128xf32>
    tpu.vector_store %arg12[%c0_12, %c0_13], %15 {strides = array<i32>} : memref<8x128xf32, #tpu.memory_space<vmem>>, vector<8x128xf32>,
    %c0_i32_14 = arith.constant 0 : i32
    %17 = arith.cmpi eq, %arg0, %c0_i32_14 : i32
    %18 = arith.extui %17 : i1 to i32
    %c0_i32_15 = arith.constant 0 : i32
    %19 = arith.cmpi ne, %18, %c0_i32_15 : i32
    scf.if %19 {
      %c0_16 = arith.constant 0 : index
      %c0_17 = arith.constant 0 : index
      %20 = vector.load %arg12[%c0_16, %c0_17] : memref<8x128xf32, #tpu.memory_space<vmem>>, vector<8x128xf32>
      %c0_18 = arith.constant 0 : index
      %c0_19 = arith.constant 0 : index
      %21 = vector.load %arg6[%c0_18, %c0_19] : memref<128x128xf32, #tpu.memory_space<vmem>>, vector<128x128xf32>
      %cst_20 = arith.constant dense<0.000000e+00> : vector<8x128xf32>
      %22 = tpu.matmul %20, %21, %cst_20 {dimension_numbers = #tpu.dot_dimension_numbers<[1], [0], [0], [1], [0, 0, 1, 1], [], []>} : vector<8x128xf32>, vector<128x128xf32>, vector<8x128xf32> -> vector<8x128xf32>
      %c0_21 = arith.constant 0 : index
      %c0_22 = arith.constant 0 : index
      %23 = vector.load %arg7[%c0_21, %c0_22] : memref<1x128xf32, #tpu.memory_space<vmem>>, vector<1x128xf32>
      %24 = vector.broadcast %23 : vector<1x128xf32> to vector<8x128xf32>
      %25 = arith.addf %22, %24 : vector<8x128xf32>
      %c0_23 = arith.constant 0 : index
      %c0_24 = arith.constant 0 : index
      %26 = vector.load %arg8[%c0_23, %c0_24] : memref<128x128xf32, #tpu.memory_space<vmem>>, vector<128x128xf32>
      %cst_25 = arith.constant dense<0.000000e+00> : vector<8x128xf32>
      %27 = tpu.matmul %25, %26, %cst_25 {dimension_numbers = #tpu.dot_dimension_numbers<[1], [0], [0], [1], [0, 0, 1, 1], [], []>} : vector<8x128xf32>, vector<128x128xf32>, vector<8x128xf32> -> vector<8x128xf32>
      %c0_26 = arith.constant 0 : index
      %c0_27 = arith.constant 0 : index
      %28 = vector.load %arg9[%c0_26, %c0_27] : memref<1x128xf32, #tpu.memory_space<vmem>>, vector<1x128xf32>
      %29 = vector.broadcast %28 : vector<1x128xf32> to vector<8x128xf32>
      %30 = arith.addf %27, %29 : vector<8x128xf32>
      %c0_28 = arith.constant 0 : index
      %c0_29 = arith.constant 0 : index
      %31 = vector.load %arg10[%c0_28, %c0_29] : memref<8x128xf32, #tpu.memory_space<vmem>>, vector<8x128xf32>
      tpu.vector_store %arg10[%c0_28, %c0_29], %30 {strides = array<i32>} : memref<8x128xf32, #tpu.memory_space<vmem>>, vector<8x128xf32>,
    } else {
    }
    return
  }
  func.func @transform_0(%arg0: i32) -> (i32, i32) {
    %c0_i32 = arith.constant 0 : i32
    %c0_i32_0 = arith.constant 0 : i32
    return %arg0, %c0_i32 : i32, i32
  }
  func.func @transform_1(%arg0: i32) -> (i32, i32) {
    %c0_i32 = arith.constant 0 : i32
    %c0_i32_0 = arith.constant 0 : i32
    return %c0_i32, %arg0 : i32, i32
  }
  func.func @transform_2(%arg0: i32) -> (i32, i32) {
    %c0_i32 = arith.constant 0 : i32
    %c0_i32_0 = arith.constant 0 : i32
    %c0_i32_1 = arith.constant 0 : i32
    return %c0_i32, %c0_i32_0 : i32, i32
  }
  func.func @transform_3(%arg0: i32) -> (i32, i32) {
    %c0_i32 = arith.constant 0 : i32
    %c0_i32_0 = arith.constant 0 : i32
    %c0_i32_1 = arith.constant 0 : i32
    return %c0_i32, %c0_i32_0 : i32, i32
  }
  func.func @transform_4(%arg0: i32) -> (i32, i32) {
    %c0_i32 = arith.constant 0 : i32
    %c0_i32_0 = arith.constant 0 : i32
    %c0_i32_1 = arith.constant 0 : i32
    return %c0_i32, %c0_i32_0 : i32, i32
  }
  func.func @transform_5(%arg0: i32) -> (i32, i32) {
    %c0_i32 = arith.constant 0 : i32
    %c0_i32_0 = arith.constant 0 : i32
    %c0_i32_1 = arith.constant 0 : i32
    return %c0_i32, %c0_i32_0 : i32, i32
  }
  func.func @transform_6(%arg0: i32) -> (i32, i32) {
    %c0_i32 = arith.constant 0 : i32
    %c0_i32_0 = arith.constant 0 : i32
    %c0_i32_1 = arith.constant 0 : i32
    return %c0_i32, %c0_i32_0 : i32, i32
  }
  func.func @transform_7(%arg0: i32) -> (i32, i32) {
    %c0_i32 = arith.constant 0 : i32
    %c0_i32_0 = arith.constant 0 : i32
    %c0_i32_1 = arith.constant 0 : i32
    return %c0_i32, %c0_i32_0 : i32, i32
  }
  func.func @transform_8(%arg0: i32) -> (i32, i32) {
    %c0_i32 = arith.constant 0 : i32
    %c0_i32_0 = arith.constant 0 : i32
    %c0_i32_1 = arith.constant 0 : i32
    return %c0_i32, %c0_i32_0 : i32, i32
  }
  func.func @transform_9(%arg0: i32) -> (i32, i32) {
    %c0_i32 = arith.constant 0 : i32
    %c0_i32_0 = arith.constant 0 : i32
    %c0_i32_1 = arith.constant 0 : i32
    return %c0_i32, %c0_i32_0 : i32, i32
  }
}

</mosaic_0001>

<bundles_post_ra>
// kernel: tpu_custom_call.1
= control target key start
LH: loop header
LB: loop body
LE: loop exit
PB: predicated region body
PF: predicated region fallthrough
CT: control target
= control target key end

     0   :  { %14 = vsyncpa [#allocation5], 0  ;;  %s2113_s0 = inlined_call_operand.hbm [shape: bf16[256,256], index: 0, kind: input, shape index: {}]   ;;  %s2114_s1 = inlined_call_operand.hbm [shape: bf16[8,256], index: 1, kind: input, shape index: {}]   ;;  %s2115_s2 = inlined_call_operand.hbm [shape: bf16[256,128], index: 2, kind: input, shape index: {}]   ;;  %s2116_s3 = inlined_call_operand.hbm [shape: bf16[128,128], index: 3, kind: input, shape index: {}]   ;;  %s2117_s4 = inlined_call_operand.vmem [shape: f32[1,128], index: 4, kind: input, shape index: {}]   ;;  %s2118_s5 = inlined_call_operand.hbm [shape: f32[128,128], index: 5, kind: input, shape index: {}]   ;;  %s2119_s6 = inlined_call_operand.vmem [shape: f32[1,128], index: 6, kind: input, shape index: {}]   ;;  %s2120_s7 = inlined_call_operand.hbm [shape: f32[128,128], index: 7, kind: input, shape index: {}]   ;;  %s2121_s8 = inlined_call_operand.vmem [shape: f32[1,128], index: 8, kind: input, shape index: {}]   ;;  %s2122_s9 = inlined_call_operand.hbm [shape: f32[8,128], index: 9, kind: output, shape index: {}]  }
   0x1   :  { %15 = vsyncpa [#allocation8], 0 }
   0x2   :  { %16 = vsyncpa [#allocation11], 0 }
   0x3   :  { %17 = vsyncpa [#allocation14], 0 }
   0x4   :  { %18 = vsyncpa [#allocation6], 0  ;;  %s1859_s30 = smov [#allocation7]   ;;  %s1695_s13 = scalar_lea.hbm %s2114_s1, 128 }
   0x5   :  { %s37_s10 = sshll.u32 %s1859_s30, 4  ;;  %p1696_p0 = scmp.ne.s32.totalorder %s2114_s1, %s1695_s13  ;;  %s38_s10 = int_to_ptr.vmem [resolvable:$true] %s37_s10 }
   0x6   :  { %p1699_p1 = scmp.lt.u32.totalorder %s1695_s13, %s2114_s1 }
   0x8   :  { %p1701_p2 = pnand %p1699_p1, %p1696_p0 }
   0xa   :  { %1704 = shalt.err (!%p1701_p2)
}
   0xb   :  { %s1705_s18 = scalar_lea.vmem %s38_s10, 128  ;;  %p1710_p4 = scmp.lt.s32.totalorder %s38_s10, %s38_s10 }
   0xc   :  { %p1706_p3 = scmp.ne.s32.totalorder %s38_s10, %s1705_s18  ;;  %p1711_p5 = scmp.lt.s32.totalorder %s1705_s18, %s1705_s18 }
   0xe   :  { %p1712_p6 = por %p1711_p5, %p1710_p4 }
  0x10   :  { %p1713_p7 = pnand %p1712_p6, %p1706_p3 }
  0x12   :  { %1716 = shalt.err (!%p1713_p7)
}
  0x13   :  { %40 = dma.hbm_to_vmem [thread:$0]  %s2114_s1, 128, %s38_s10, [#allocation8]  }
  0x14   :  { %s1860_s21 = smov [#allocation10]   ;;  %s1861_s23 = smov [#allocation4]  }
  0x15   :  { %s58_s22 = sshll.u32 %s1860_s21, 4  ;;  %s24_s24 = sshll.u32 %s1861_s23, 4  ;;  %s59_s22 = int_to_ptr.vmem [resolvable:$true] %s58_s22  ;;  %s25_s24 = int_to_ptr.vmem [resolvable:$true] %s24_s24 }
  0x16   :  { %s1717_s27 = scalar_lea.hbm %s2116_s3, 1024 }
  0x17   :  { %p1718_p8 = scmp.ne.s32.totalorder %s2116_s3, %s1717_s27  ;;  %p1721_p9 = scmp.lt.u32.totalorder %s1717_s27, %s2116_s3 }
  0x19   :  { %p1723_p10 = pnand %p1721_p9, %p1718_p8 }
  0x1b   :  { %1726 = shalt.err (!%p1723_p10)
}
  0x1c   :  { %s1727_s1 = scalar_lea.vmem %s59_s22, 1024  ;;  %p1732_p12 = scmp.lt.s32.totalorder %s59_s22, %s59_s22 }
  0x1d   :  { %p1728_p11 = scmp.ne.s32.totalorder %s59_s22, %s1727_s1  ;;  %p1733_p13 = scmp.lt.s32.totalorder %s1727_s1, %s1727_s1 }
  0x1f   :  { %p1734_p0 = por %p1733_p13, %p1732_p12 }
  0x21   :  { %p1735_p1 = pnand %p1734_p0, %p1728_p11 }
  0x23   :  { %1738 = shalt.err (!%p1735_p1)
}
  0x24   :  { %s1862_s10 = smov 64   ;;  %s1863_s12 = smov 4  }
  0x25   :  { %64 = dma.hbm_to_vmem [thread:$0]  %s2116_s3, 1024, %s59_s22, [#allocation11], %s1862_s10, %s1862_s10, %s1863_s12  }
  0x26   :  { %s1739_s17 = scalar_lea.hbm %s2113_s0, 4096 }
  0x27   :  { %p1740_p2 = scmp.ne.s32.totalorder %s2113_s0, %s1739_s17  ;;  %p1743_p3 = scmp.lt.u32.totalorder %s1739_s17, %s2113_s0 }
  0x29   :  { %p1745_p4 = pnand %p1743_p3, %p1740_p2 }
  0x2b   :  { %1748 = shalt.err (!%p1745_p4)
}
  0x2c   :  { %s1749_s23 = scalar_lea.vmem %s25_s24, 4096  ;;  %p1754_p6 = scmp.lt.s32.totalorder %s25_s24, %s25_s24 }
  0x2d   :  { %p1750_p5 = scmp.ne.s32.totalorder %s25_s24, %s1749_s23  ;;  %p1755_p7 = scmp.lt.s32.totalorder %s1749_s23, %s1749_s23 }
  0x2f   :  { %p1756_p8 = por %p1755_p7, %p1754_p6 }
  0x31   :  { %p1757_p9 = pnand %p1756_p8, %p1750_p5 }
  0x33   :  { %1760 = shalt.err (!%p1757_p9)
}
  0x34   :  { %s1864_s3 = smov 128   ;;  %s1865_s22 = smov 8  }
  0x35   :  { %30 = dma.hbm_to_vmem [thread:$0]  %s2113_s0, 4096, %s25_s24, [#allocation5], %s1864_s3, %s1864_s3, %s1865_s22  }
  0x36   :  { %s1866_s27 = smov [#allocation9]   ;;  %s1867_s29 = smov [#allocation12]  }
  0x37   :  { %s46_s28 = sshll.u32 %s1866_s27, 4  ;;  %s72_s30 = sshll.u32 %s1867_s29, 4  ;;  %s47_s28 = int_to_ptr.vmem [resolvable:$true] %s46_s28  ;;  %s73_s30 = int_to_ptr.vmem [resolvable:$true] %s72_s30 }
  0x38   :  { %s1761_s13 = scalar_lea.hbm %s2115_s2, 2048 }
  0x39   :  { %p1762_p10 = scmp.ne.s32.totalorder %s2115_s2, %s1761_s13  ;;  %p1765_p11 = scmp.lt.u32.totalorder %s1761_s13, %s2115_s2 }
  0x3b   :  { %p1767_p12 = pnand %p1765_p11, %p1762_p10 }
  0x3d   :  { %1770 = shalt.err (!%p1767_p12)
}
  0x3e   :  { %s1771_s0 = scalar_lea.vmem %s47_s28, 2048  ;;  %p1776_p0 = scmp.lt.s32.totalorder %s47_s28, %s47_s28 }
  0x3f   :  { %p1772_p13 = scmp.ne.s32.totalorder %s47_s28, %s1771_s0  ;;  %p1777_p1 = scmp.lt.s32.totalorder %s1771_s0, %s1771_s0 }
  0x41   :  { %p1778_p2 = por %p1777_p1, %p1776_p0 }
  0x43   :  { %p1779_p3 = pnand %p1778_p2, %p1772_p13 }
  0x45   :  { %1782 = shalt.err (!%p1779_p3)
}
  0x46   :  { %52 = dma.hbm_to_vmem [thread:$0]  %s2115_s2, 2048, %s47_s28, [#allocation8], %s1862_s10, %s1862_s10, %s1863_s12  }
  0x47   :  { %s1783_s21 = scalar_lea.hbm %s2118_s5, 2048 }
  0x48   :  { %p1784_p4 = scmp.ne.s32.totalorder %s2118_s5, %s1783_s21  ;;  %p1787_p5 = scmp.lt.u32.totalorder %s1783_s21, %s2118_s5 }
  0x4a   :  { %p1789_p6 = pnand %p1787_p5, %p1784_p4 }
  0x4c   :  { %1792 = shalt.err (!%p1789_p6)
}
  0x4d   :  { %s1793_s29 = scalar_lea.vmem %s73_s30, 2048  ;;  %p1798_p8 = scmp.lt.s32.totalorder %s73_s30, %s73_s30 }
  0x4e   :  { %p1794_p7 = scmp.ne.s32.totalorder %s73_s30, %s1793_s29  ;;  %p1799_p9 = scmp.lt.s32.totalorder %s1793_s29, %s1793_s29 }
  0x50   :  { %p1800_p10 = por %p1799_p9, %p1798_p8 }
  0x52   :  { %p1801_p11 = pnand %p1800_p10, %p1794_p7 }
  0x54   :  { %1804 = shalt.err (!%p1801_p11)
}
  0x55   :  { %78 = dma.hbm_to_vmem [thread:$0]  %s2118_s5, 2048, %s73_s30, [#allocation11], %s1864_s3, %s1864_s3, %s1865_s22  }
  0x56   :  { %s1868_s12 = smov [#allocation13]   ;;  %s1805_s13 = scalar_lea.hbm %s2120_s7, 2048 }
  0x57   :  { %s86_s28 = sshll.u32 %s1868_s12, 4  ;;  %p1806_p12 = scmp.ne.s32.totalorder %s2120_s7, %s1805_s13  ;;  %s87_s28 = int_to_ptr.vmem [resolvable:$true] %s86_s28 }
  0x58   :  { %p1809_p13 = scmp.lt.u32.totalorder %s1805_s13, %s2120_s7 }
  0x5a   :  { %p1811_p0 = pnand %p1809_p13, %p1806_p12 }
  0x5c   :  { %1814 = shalt.err (!%p1811_p0)
}
  0x5d   :  { %s1815_s0 = scalar_lea.vmem %s87_s28, 2048  ;;  %p1820_p2 = scmp.lt.s32.totalorder %s87_s28, %s87_s28 }
  0x5e   :  { %p1816_p1 = scmp.ne.s32.totalorder %s87_s28, %s1815_s0  ;;  %p1821_p3 = scmp.lt.s32.totalorder %s1815_s0, %s1815_s0 }
  0x60   :  { %p1822_p4 = por %p1821_p3, %p1820_p2 }
  0x62   :  { %p1823_p5 = pnand %p1822_p4, %p1816_p1 }
  0x64   :  { %1826 = shalt.err (!%p1823_p5)
}
  0x65   :  { %92 = dma.hbm_to_vmem [thread:$0]  %s2120_s7, 2048, %s87_s28, [#allocation14], %s1864_s3, %s1864_s3, %s1865_s22  }
  0x66   :  { %1849 = dma.done.wait [#allocation5], 4096  }
  0x67   :  { %1850 = vsyncadd [#allocation5], 4294963200 }
  0x68   :  { %1851 = dma.done.wait [#allocation8], 2176  }
  0x69   :  { %1852 = vsyncadd [#allocation8], 4294965120 }
  0x6a   :  { %1853 = dma.done.wait [#allocation11], 3072  }
  0x6b   :  { %1854 = vsyncadd [#allocation11], 4294964224 }
  0x6c   :  { %1855 = dma.done.wait [#allocation14], 2048  }
  0x6d   :  { %1856 = vsyncadd [#allocation14], 4294965248  ;;  %v1621_v0 = vld [vmem:[#allocation10] sm:$0xff]   ;;  %v1622_v1 = vld [vmem:[#allocation10 + $0x8] sm:$0xff]   ;;  %vm1870_vm0 = vmmov 0   ;;  %s1872_s19 = smov [#allocation15]  }
  0x6e   :  { %1441 = vmatprep.subr.bf16.mxu0 %v1621_v0  ;;  %v1623_v2 = vld [vmem:[#allocation10 + $0x10] sm:$0xff]   ;;  %v1624_v3 = vld [vmem:[#allocation10 + $0x18] sm:$0xff]   ;;  %v1629_v4 = vld [vmem:[#allocation9] sm:$0xff]   ;;  %s1176_s20 = sshll.u32 %s1872_s19, 4  ;;  %s1177_s20 = int_to_ptr.vmem [resolvable:$true] %s1176_s20 }
  0x6f   :  { %1442 = vmatpush3.bf16.msra.mxu0 %v1621_v0  ;;  %1457 = vmatprep.mubr.bf16.mxu0 %v1629_v4  ;;  %v1625_v5 = vld [vmem:[#allocation10 + $0x20] sm:$0xff]   ;;  %v1626_v6 = vld [vmem:[#allocation10 + $0x28] sm:$0xff]   ;;  %v1627_v7 = vld [vmem:[#allocation10 + $0x30] sm:$0xff]   ;;  %s1827_s21 = scalar_lea.vmem %s1177_s20, 128  ;;  %p1832_p7 = scmp.lt.s32.totalorder %s1177_s20, %s1177_s20 }
  0x70   :  { %1443 = vmatprep.subr.bf16.mxu0 %v1622_v1  ;;  %v1628_v8 = vld [vmem:[#allocation10 + $0x38] sm:$0xff]   ;;  %v1630_v9 = vld [vmem:[#allocation9 + $0x8] sm:$0xff]   ;;  %v1631_v10 = vld [vmem:[#allocation9 + $0x10] sm:$0xff]   ;;  %p1828_p6 = scmp.ne.s32.totalorder %s1177_s20, %s1827_s21  ;;  %p1833_p8 = scmp.lt.s32.totalorder %s1827_s21, %s1827_s21 }
  0x71   :  { %v1632_v11 = vld [vmem:[#allocation9 + $0x18] sm:$0xff]   ;;  %v1633_v12 = vld [vmem:[#allocation9 + $0x20] sm:$0xff]   ;;  %v1634_v13 = vld [vmem:[#allocation9 + $0x28] sm:$0xff]  }
  0x72   :  { %v1635_v14 = vld [vmem:[#allocation9 + $0x30] sm:$0xff]   ;;  %v1636_v15 = vld [vmem:[#allocation9 + $0x38] sm:$0xff]   ;;  %v1637_v16 = vld [vmem:[#allocation9 + $0x40] sm:$0xff]   ;;  %p1834_p9 = por %p1833_p8, %p1832_p7 }
  0x73   :  { %1444 = vmatpush3.bf16.msra.mxu0 %v1622_v1  ;;  %v1638_v17 = vld [vmem:[#allocation9 + $0x48] sm:$0xff]   ;;  %v1639_v18 = vld [vmem:[#allocation9 + $0x50] sm:$0xff]   ;;  %v1640_v19 = vld [vmem:[#allocation9 + $0x58] sm:$0xff]  }
  0x74   :  { %1445 = vmatprep.subr.bf16.mxu0 %v1623_v2  ;;  %v1641_v20 = vld [vmem:[#allocation9 + $0x60] sm:$0xff]   ;;  %v1642_v21 = vld [vmem:[#allocation9 + $0x68] sm:$0xff]   ;;  %v1643_v22 = vld [vmem:[#allocation9 + $0x70] sm:$0xff]   ;;  %p1835_p10 = pnand %p1834_p9, %p1828_p6 }
  0x75   :  { %v1644_v23 = vld [vmem:[#allocation9 + $0x78] sm:$0xff]  }
  0x76   :  { %v1647_v24 = vld [vmem:[#allocation4 + $0x4] ss:$8 sps:$4 sm:$0xff]  }
  0x77   :  { %1446 = vmatpush3.bf16.msra.mxu0 %v1623_v2  ;;  %751 = vmatprep.mubr.bf16.mxu1 %v1647_v24  ;;  %v1669_v24 = vld [vmem:[#allocation4 + $0x84] ss:$8 sps:$4 sm:$0xff]  }
  0x78   :  { %1447 = vmatprep.subr.bf16.mxu0 %v1624_v3 }
  0x7b   :  { %1448 = vmatpush3.bf16.msra.mxu0 %v1624_v3 }
  0x7c   :  { %1449 = vmatprep.subr.bf16.mxu0 %v1625_v5 }
  0x7f   :  { %1450 = vmatpush3.bf16.msra.mxu0 %v1625_v5 }
  0x80   :  { %1451 = vmatprep.subr.bf16.mxu0 %v1626_v6 }
  0x83   :  { %1452 = vmatpush3.bf16.msra.mxu0 %v1626_v6 }
  0x84   :  { %1453 = vmatprep.subr.bf16.mxu0 %v1627_v7 }
  0x87   :  { %1454 = vmatpush3.bf16.msra.mxu0 %v1627_v7 }
  0x88   :  { %1455 = vmatprep.subr.bf16.mxu0 %v1628_v8 }
  0x8b   :  { %1456 = vmatpush3.bf16.msra.mxu0 %v1628_v8 }
  0x8e   :  { %1458 = vmatmul.mubr.bf16.vlgmr.msra.gmra.mrb[0].mxu0 %v1630_v9  ;;  %v1645_v9 = vld [vmem:[#allocation4] ss:$8 sps:$4 sm:$0xff]  }
  0x8f   :  { %1461 = vmatprep.mubr.bf16.mxu0 %v1631_v10  ;;  %v1648_v10 = vld [vmem:[#allocation4 + $0x14] ss:$8 sps:$4 sm:$0xff]  }
  0x96   :  { %1462 = vmatmul.mubr.bf16.gmra.mrb[4].mxu0 %v1632_v11  ;;  %v1650_v11 = vld [vmem:[#allocation4 + $0x10] ss:$8 sps:$4 sm:$0xff]  }
  0x97   :  { %1465 = vmatprep.mubr.bf16.mxu0 %v1633_v12  ;;  %v1651_v12 = vld [vmem:[#allocation4 + $0x24] ss:$8 sps:$4 sm:$0xff]  }
  0x9e   :  { %1466 = vmatmul.mubr.bf16.gmra.mrb[8].mxu0 %v1634_v13  ;;  %v1653_v13 = vld [vmem:[#allocation4 + $0x20] ss:$8 sps:$4 sm:$0xff]  }
  0x9f   :  { %1469 = vmatprep.mubr.bf16.mxu0 %v1635_v14  ;;  %v1654_v14 = vld [vmem:[#allocation4 + $0x34] ss:$8 sps:$4 sm:$0xff]  }
  0xa6   :  { %1470 = vmatmul.mubr.bf16.gmra.mrb[12].mxu0 %v1636_v15  ;;  %v1656_v15 = vld [vmem:[#allocation4 + $0x30] ss:$8 sps:$4 sm:$0xff]  }
  0xa7   :  { %1473 = vmatprep.mubr.bf16.mxu0 %v1637_v16  ;;  %v1657_v16 = vld [vmem:[#allocation4 + $0x44] ss:$8 sps:$4 sm:$0xff]  }
  0xae   :  { %1474 = vmatmul.mubr.bf16.gmra.mrb[16].mxu0 %v1638_v17  ;;  %v1659_v17 = vld [vmem:[#allocation4 + $0x40] ss:$8 sps:$4 sm:$0xff]  }
  0xaf   :  { %1477 = vmatprep.mubr.bf16.mxu0 %v1639_v18  ;;  %v1660_v18 = vld [vmem:[#allocation4 + $0x54] ss:$8 sps:$4 sm:$0xff]  }
  0xb6   :  { %1478 = vmatmul.mubr.bf16.gmra.mrb[20].mxu0 %v1640_v19  ;;  %v1662_v19 = vld [vmem:[#allocation4 + $0x50] ss:$8 sps:$4 sm:$0xff]  }
  0xb7   :  { %1481 = vmatprep.mubr.bf16.mxu0 %v1641_v20  ;;  %v1663_v20 = vld [vmem:[#allocation4 + $0x64] ss:$8 sps:$4 sm:$0xff]  }
  0xbe   :  { %1482 = vmatmul.mubr.bf16.gmra.mrb[24].mxu0 %v1642_v21  ;;  %v1665_v21 = vld [vmem:[#allocation4 + $0x60] ss:$8 sps:$4 sm:$0xff]  }
  0xbf   :  { %1485 = vmatprep.mubr.bf16.mxu0 %v1643_v22  ;;  %v1666_v22 = vld [vmem:[#allocation4 + $0x74] ss:$8 sps:$4 sm:$0xff]  }
  0xc6   :  { %1486 = vmatmul.mubr.bf16.gmra.mrb[28].mxu0 %v1644_v23  ;;  %v1668_v23 = vld [vmem:[#allocation4 + $0x70] ss:$8 sps:$4 sm:$0xff]  }
 0x161   :  { %v1459_v25 = vpop.f32.mrb[0].mxu0 }
 0x162   :  { %v344_v26 = vpop.f32.mrb[1].mxu0 }
 0x163   :  { %v1460_v27 = vpop.f32.mrb[2].mxu0 }
 0x164   :  { %v472_v28 = vpack.c.bf16 %v1460_v27, %v1459_v25  ;;  %v347_v29 = vpop.f32.mrb[3].mxu0  ;;  %v1671_v25 = vld [vmem:[#allocation4 + $0x80] ss:$8 sps:$4 sm:$0xff]   ;;  %v1674_v27 = vld [vmem:[#allocation4 + $0x90] ss:$8 sps:$4 sm:$0xff]  }
 0x165   :  { %v471_v30 = vpack.c.bf16 %v347_v29, %v344_v26  ;;  %v1672_v26 = vld [vmem:[#allocation4 + $0x94] ss:$8 sps:$4 sm:$0xff]   ;;  %v1677_v29 = vld [vmem:[#allocation4 + $0xa0] ss:$8 sps:$4 sm:$0xff]  }
 0x169   :  { %v1463_v31 = vpop.f32.mrb[4].mxu0 }
 0x16a   :  { %v360_v32 = vpop.f32.mrb[5].mxu0 }
 0x16b   :  { %v1464_v33 = vpop.f32.mrb[6].mxu0 }
 0x16c   :  { %v474_v34 = vpack.c.bf16 %v1464_v33, %v1463_v31  ;;  %v363_v35 = vpop.f32.mrb[7].mxu0  ;;  %v1680_v31 = vld [vmem:[#allocation4 + $0xb0] ss:$8 sps:$4 sm:$0xff]   ;;  %v1683_v33 = vld [vmem:[#allocation4 + $0xc0] ss:$8 sps:$4 sm:$0xff]  }
 0x16d   :  { %v473_v36 = vpack.c.bf16 %v363_v35, %v360_v32  ;;  %v1681_v32 = vld [vmem:[#allocation4 + $0xc4] ss:$8 sps:$4 sm:$0xff]   ;;  %v1686_v35 = vld [vmem:[#allocation4 + $0xd0] ss:$8 sps:$4 sm:$0xff]  }
 0x171   :  { %v1467_v37 = vpop.f32.mrb[8].mxu0 }
 0x172   :  { %v376_v38 = vpop.f32.mrb[9].mxu0 }
 0x173   :  { %v1468_v39 = vpop.f32.mrb[10].mxu0 }
 0x174   :  { %v476_v40 = vpack.c.bf16 %v1468_v39, %v1467_v37  ;;  %v379_v41 = vpop.f32.mrb[11].mxu0  ;;  %v1689_v37 = vld [vmem:[#allocation4 + $0xe0] ss:$8 sps:$4 sm:$0xff]   ;;  %v1692_v39 = vld [vmem:[#allocation4 + $0xf0] ss:$8 sps:$4 sm:$0xff]  }
 0x175   :  { %v475_v42 = vpack.c.bf16 %v379_v41, %v376_v38  ;;  %v1690_v38 = vld [vmem:[#allocation4 + $0xf4] ss:$8 sps:$4 sm:$0xff]   ;;  %v2013_v41 = vld [vmem:[%s2117_s4] ss:$0 sm:$0xff] }
 0x179   :  { %v1471_v43 = vpop.f32.mrb[12].mxu0 }
 0x17a   :  { %v392_v44 = vpop.f32.mrb[13].mxu0 }
 0x17b   :  { %v1472_v45 = vpop.f32.mrb[14].mxu0 }
 0x17c   :  { %v478_v46 = vpack.c.bf16 %v1472_v45, %v1471_v43  ;;  %v395_v47 = vpop.f32.mrb[15].mxu0 }
 0x17d   :  { %v477_v48 = vpack.c.bf16 %v395_v47, %v392_v44 }
 0x181   :  { %v1475_v49 = vpop.f32.mrb[16].mxu0 }
 0x182   :  { %v408_v50 = vpop.f32.mrb[17].mxu0 }
 0x183   :  { %v1476_v51 = vpop.f32.mrb[18].mxu0 }
 0x184   :  { %v480_v52 = vpack.c.bf16 %v1476_v51, %v1475_v49  ;;  %v411_v53 = vpop.f32.mrb[19].mxu0 }
 0x185   :  { %v479_v54 = vpack.c.bf16 %v411_v53, %v408_v50 }
 0x187   :  { %1273 = vmatprep.subr.bf16.mxu1 %v479_v54 }
 0x188   :  { %1274 = vmatpush3.bf16.msra.mxu1 %v471_v30  ;;  %v1678_v30 = vld [vmem:[#allocation4 + $0xb4] ss:$8 sps:$4 sm:$0xff]  }
 0x189   :  { %v1479_v55 = vpop.f32.mrb[20].mxu0  ;;  %1275 = vmatprep.subr.bf16.mxu1 %v480_v52 }
 0x18a   :  { %v424_v56 = vpop.f32.mrb[21].mxu0 }
 0x18b   :  { %v1480_v57 = vpop.f32.mrb[22].mxu0 }
 0x18c   :  { %v482_v58 = vpack.c.bf16 %v1480_v57, %v1479_v55  ;;  %v427_v59 = vpop.f32.mrb[23].mxu0  ;;  %1276 = vmatpush3.bf16.msra.mxu1 %v472_v28  ;;  %v1675_v28 = vld [vmem:[#allocation4 + $0xa4] ss:$8 sps:$4 sm:$0xff]  }
 0x18d   :  { %v481_v60 = vpack.c.bf16 %v427_v59, %v424_v56 }
 0x18f   :  { %1277 = vmatprep.subr.bf16.mxu1 %v481_v60 }
 0x190   :  { %1278 = vmatpush3.bf16.msra.mxu1 %v473_v36  ;;  %v1687_v36 = vld [vmem:[#allocation4 + $0xe4] ss:$8 sps:$4 sm:$0xff]  }
 0x191   :  { %v1483_v61 = vpop.f32.mrb[24].mxu0  ;;  %1279 = vmatprep.subr.bf16.mxu1 %v482_v58 }
 0x192   :  { %v440_v62 = vpop.f32.mrb[25].mxu0 }
 0x193   :  { %v1484_v63 = vpop.f32.mrb[26].mxu0 }
 0x194   :  { %v484_v0 = vpack.c.bf16 %v1484_v63, %v1483_v61  ;;  %v443_v1 = vpop.f32.mrb[27].mxu0  ;;  %1280 = vmatpush3.bf16.msra.mxu1 %v474_v34  ;;  %v1684_v34 = vld [vmem:[#allocation4 + $0xd4] ss:$8 sps:$4 sm:$0xff]  }
 0x195   :  { %v483_v2 = vpack.c.bf16 %v443_v1, %v440_v62 }
 0x197   :  { %1281 = vmatprep.subr.bf16.mxu1 %v483_v2 }
 0x198   :  { %1282 = vmatpush3.bf16.msra.mxu1 %v475_v42 }
 0x199   :  { %v1487_v3 = vpop.f32.mrb[28].mxu0  ;;  %1283 = vmatprep.subr.bf16.mxu1 %v484_v0 }
 0x19a   :  { %v456_v4 = vpop.f32.mrb[29].mxu0 }
 0x19b   :  { %v1488_v5 = vpop.f32.mrb[30].mxu0 }
 0x19c   :  { %v486_v6 = vpack.c.bf16 %v1488_v5, %v1487_v3  ;;  %v459_v7 = vpop.f32.mrb[31].mxu0  ;;  %1284 = vmatpush3.bf16.msra.mxu1 %v476_v40 }
 0x19d   :  { %v485_v8 = vpack.c.bf16 %v459_v7, %v456_v4 }
 0x19f   :  { %1285 = vmatprep.subr.bf16.mxu1 %v485_v8 }
 0x1a0   :  { %1286 = vmatpush3.bf16.msra.mxu1 %v477_v48  ;;  %v2016_v48 = vld [vmem:[#allocation7] sm:$0xff] }
 0x1a1   :  { %1287 = vmatprep.subr.bf16.mxu1 %v486_v6  ;;  %v1246_v49 = vcombine.high %v2016_v48, %v2016_v48 }
 0x1a3   :  { %969 = vmatprep.mubr.bf16.mxu0 %v1246_v49 }
 0x1a4   :  { %1288 = vmatpush3.bf16.msra.mxu1 %v478_v46 }
 0x1a7   :  { %752 = vmatmul.mubr.bf16.vlgmr.msra.gmra.mrb[0].mxu1 %v1645_v9 }
 0x1a8   :  { %759 = vmatprep.mubr.bf16.mxu1 %v1648_v10 }
 0x1af   :  { %760 = vmatmul.mubr.bf16.gmra.mrb[4].mxu1 %v1650_v11 }
 0x1b0   :  { %767 = vmatprep.mubr.bf16.mxu1 %v1651_v12 }
 0x1b7   :  { %768 = vmatmul.mubr.bf16.gmra.mrb[8].mxu1 %v1653_v13 }
 0x1b8   :  { %775 = vmatprep.mubr.bf16.mxu1 %v1654_v14 }
 0x1bf   :  { %776 = vmatmul.mubr.bf16.gmra.mrb[12].mxu1 %v1656_v15 }
 0x1c0   :  { %783 = vmatprep.mubr.bf16.mxu1 %v1657_v16 }
 0x1c7   :  { %784 = vmatmul.mubr.bf16.gmra.mrb[16].mxu1 %v1659_v17 }
 0x1c8   :  { %791 = vmatprep.mubr.bf16.mxu1 %v1660_v18 }
 0x1cf   :  { %792 = vmatmul.mubr.bf16.gmra.mrb[20].mxu1 %v1662_v19 }
 0x1d0   :  { %799 = vmatprep.mubr.bf16.mxu1 %v1663_v20 }
 0x1d7   :  { %800 = vmatmul.mubr.bf16.gmra.mrb[24].mxu1 %v1665_v21 }
 0x1d8   :  { %807 = vmatprep.mubr.bf16.mxu1 %v1666_v22 }
 0x1df   :  { %808 = vmatmul.mubr.bf16.gmra.mrb[28].mxu1 %v1668_v23 }
 0x1e0   :  { %815 = vmatprep.mubr.bf16.mxu1 %v1669_v24 }
 0x1e7   :  { %816 = vmatmul.mubr.bf16.gmra.mrb[32].mxu1 %v1671_v25 }
 0x1e8   :  { %823 = vmatprep.mubr.bf16.mxu1 %v1672_v26 }
 0x1ef   :  { %824 = vmatmul.mubr.bf16.gmra.mrb[36].mxu1 %v1674_v27 }
 0x1f0   :  { %831 = vmatprep.mubr.bf16.mxu1 %v1675_v28 }
 0x1f7   :  { %832 = vmatmul.mubr.bf16.gmra.mrb[40].mxu1 %v1677_v29 }
 0x1f8   :  { %839 = vmatprep.mubr.bf16.mxu1 %v1678_v30 }
 0x1ff   :  { %840 = vmatmul.mubr.bf16.gmra.mrb[44].mxu1 %v1680_v31 }
 0x200   :  { %847 = vmatprep.mubr.bf16.mxu1 %v1681_v32 }
 0x207   :  { %848 = vmatmul.mubr.bf16.gmra.mrb[48].mxu1 %v1683_v33 }
 0x208   :  { %855 = vmatprep.mubr.bf16.mxu1 %v1684_v34 }
 0x20f   :  { %856 = vmatmul.mubr.bf16.gmra.mrb[52].mxu1 %v1686_v35 }
 0x210   :  { %863 = vmatprep.mubr.bf16.mxu1 %v1687_v36 }
 0x217   :  { %864 = vmatmul.mubr.bf16.gmra.mrb[56].mxu1 %v1689_v37 }
 0x218   :  { %871 = vmatprep.mubr.bf16.mxu1 %v1690_v38 }
 0x21f   :  { %872 = vmatmul.mubr.bf16.gmra.mrb[60].mxu1 %v1692_v39 }
 0x27a   :  { %v1289_v40 = vpop.f32.mrb[0].mxu1 }
 0x27b   :  { %v1290_v42 = vpop.f32.mrb[1].mxu1 }
 0x27c   :  { %v1291_v43 = vadd.f32 %v1290_v42, %v1289_v40  ;;  %v1292_v44 = vpop.f32.mrb[2].mxu1 }
 0x27d   :  { %v1293_v45 = vpop.f32.mrb[3].mxu1 }
 0x27e   :  { %v754_v46 = vadd.f32 %v1291_v43, %v2013_v41  ;;  %v1294_v47 = vadd.f32 %v1293_v45, %v1292_v44 }
 0x280   :  { %v757_v50 = vadd.f32 %v1294_v47, %v2013_v41  ;;  %v880_v51 = vmax.f32 %v754_v46, 0.0 }
 0x282   :  { %v881_v52 = vmax.f32 %v757_v50, 0.0  ;;  %v1295_v53 = vpop.f32.mrb[4].mxu1 }
 0x283   :  { %v1296_v54 = vpop.f32.mrb[5].mxu1 }
 0x284   :  { %v2021_v55 = vpack.c.bf16 %v881_v52, %v880_v51  ;;  %v1297_v56 = vadd.f32 %v1296_v54, %v1295_v53  ;;  %v1298_v57 = vpop.f32.mrb[6].mxu1 }
 0x285   :  { %v1299_v58 = vpop.f32.mrb[7].mxu1 }
 0x286   :  { %v762_v59 = vadd.f32 %v1297_v56, %v2013_v41  ;;  %v1300_v60 = vadd.f32 %v1299_v58, %v1298_v57 }
 0x288   :  { %v765_v61 = vadd.f32 %v1300_v60, %v2013_v41  ;;  %v882_v62 = vmax.f32 %v762_v59, 0.0 }
 0x28a   :  { %v883_v63 = vmax.f32 %v765_v61, 0.0  ;;  %v1301_v0 = vpop.f32.mrb[8].mxu1 }
 0x28b   :  { %v1302_v1 = vpop.f32.mrb[9].mxu1 }
 0x28c   :  { %v2025_v2 = vpack.c.bf16 %v883_v63, %v882_v62  ;;  %v1303_v3 = vadd.f32 %v1302_v1, %v1301_v0  ;;  %v1304_v4 = vpop.f32.mrb[10].mxu1 }
 0x28d   :  { %v1305_v5 = vpop.f32.mrb[11].mxu1 }
 0x28e   :  { %v770_v6 = vadd.f32 %v1303_v3, %v2013_v41  ;;  %v1306_v7 = vadd.f32 %v1305_v5, %v1304_v4 }
 0x290   :  { %v773_v8 = vadd.f32 %v1306_v7, %v2013_v41  ;;  %v884_v9 = vmax.f32 %v770_v6, 0.0 }
 0x292   :  { %v885_v10 = vmax.f32 %v773_v8, 0.0  ;;  %v1307_v11 = vpop.f32.mrb[12].mxu1 }
 0x293   :  { %v1308_v12 = vpop.f32.mrb[13].mxu1 }
 0x294   :  { %v2029_v13 = vpack.c.bf16 %v885_v10, %v884_v9  ;;  %v1309_v14 = vadd.f32 %v1308_v12, %v1307_v11  ;;  %v1310_v15 = vpop.f32.mrb[14].mxu1 }
 0x295   :  { %v1311_v16 = vpop.f32.mrb[15].mxu1 }
 0x296   :  { %v778_v17 = vadd.f32 %v1309_v14, %v2013_v41  ;;  %v1312_v18 = vadd.f32 %v1311_v16, %v1310_v15 }
 0x298   :  { %v781_v19 = vadd.f32 %v1312_v18, %v2013_v41  ;;  %v886_v20 = vmax.f32 %v778_v17, 0.0 }
 0x29a   :  { %v887_v21 = vmax.f32 %v781_v19, 0.0  ;;  %v1313_v22 = vpop.f32.mrb[16].mxu1 }
 0x29b   :  { %v1314_v23 = vpop.f32.mrb[17].mxu1 }
 0x29c   :  { %v2033_v24 = vpack.c.bf16 %v887_v21, %v886_v20  ;;  %v1315_v25 = vadd.f32 %v1314_v23, %v1313_v22  ;;  %v1316_v26 = vpop.f32.mrb[18].mxu1 }
 0x29d   :  { %v1317_v27 = vpop.f32.mrb[19].mxu1 }
 0x29e   :  { %v786_v28 = vadd.f32 %v1315_v25, %v2013_v41  ;;  %v1318_v29 = vadd.f32 %v1317_v27, %v1316_v26 }
 0x2a0   :  { %v789_v30 = vadd.f32 %v1318_v29, %v2013_v41  ;;  %v888_v31 = vmax.f32 %v786_v28, 0.0 }
 0x2a2   :  { %v889_v32 = vmax.f32 %v789_v30, 0.0  ;;  %v1319_v33 = vpop.f32.mrb[20].mxu1 }
 0x2a3   :  { %v1320_v34 = vpop.f32.mrb[21].mxu1 }
 0x2a4   :  { %v2037_v35 = vpack.c.bf16 %v889_v32, %v888_v31  ;;  %v1321_v36 = vadd.f32 %v1320_v34, %v1319_v33  ;;  %v1322_v37 = vpop.f32.mrb[22].mxu1 }
 0x2a5   :  { %v1323_v38 = vpop.f32.mrb[23].mxu1 }
 0x2a6   :  { %v794_v39 = vadd.f32 %v1321_v36, %v2013_v41  ;;  %v1324_v40 = vadd.f32 %v1323_v38, %v1322_v37 }
 0x2a8   :  { %v797_v42 = vadd.f32 %v1324_v40, %v2013_v41  ;;  %v890_v43 = vmax.f32 %v794_v39, 0.0 }
 0x2aa   :  { %v891_v44 = vmax.f32 %v797_v42, 0.0  ;;  %v1325_v45 = vpop.f32.mrb[24].mxu1 }
 0x2ab   :  { %v1326_v46 = vpop.f32.mrb[25].mxu1 }
 0x2ac   :  { %v2041_v47 = vpack.c.bf16 %v891_v44, %v890_v43  ;;  %v1327_v49 = vadd.f32 %v1326_v46, %v1325_v45  ;;  %v1328_v50 = vpop.f32.mrb[26].mxu1 }
 0x2ad   :  { %v1329_v51 = vpop.f32.mrb[27].mxu1 }
 0x2ae   :  { %v802_v52 = vadd.f32 %v1327_v49, %v2013_v41  ;;  %v1330_v53 = vadd.f32 %v1329_v51, %v1328_v50 }
 0x2b0   :  { %v805_v54 = vadd.f32 %v1330_v53, %v2013_v41  ;;  %v892_v56 = vmax.f32 %v802_v52, 0.0 }
 0x2b2   :  { %v893_v57 = vmax.f32 %v805_v54, 0.0  ;;  %v1331_v58 = vpop.f32.mrb[28].mxu1 }
 0x2b3   :  { %v1332_v59 = vpop.f32.mrb[29].mxu1 }
 0x2b4   :  { %v2045_v60 = vpack.c.bf16 %v893_v57, %v892_v56  ;;  %v1333_v61 = vadd.f32 %v1332_v59, %v1331_v58  ;;  %v1334_v62 = vpop.f32.mrb[30].mxu1 }
 0x2b5   :  { %v1335_v63 = vpop.f32.mrb[31].mxu1 }
 0x2b6   :  { %v810_v0 = vadd.f32 %v1333_v61, %v2013_v41  ;;  %v1336_v1 = vadd.f32 %v1335_v63, %v1334_v62 }
 0x2b8   :  { %v813_v3 = vadd.f32 %v1336_v1, %v2013_v41  ;;  %v894_v4 = vmax.f32 %v810_v0, 0.0 }
 0x2ba   :  { %v895_v5 = vmax.f32 %v813_v3, 0.0  ;;  %v1337_v6 = vpop.f32.mrb[32].mxu1 }
 0x2bb   :  { %v1338_v7 = vpop.f32.mrb[33].mxu1 }
 0x2bc   :  { %v2049_v8 = vpack.c.bf16 %v895_v5, %v894_v4  ;;  %v1339_v9 = vadd.f32 %v1338_v7, %v1337_v6  ;;  %v1340_v10 = vpop.f32.mrb[34].mxu1 }
 0x2bd   :  { %v1341_v11 = vpop.f32.mrb[35].mxu1 }
 0x2be   :  { %v818_v12 = vadd.f32 %v1339_v9, %v2013_v41  ;;  %v1342_v14 = vadd.f32 %v1341_v11, %v1340_v10 }
 0x2c0   :  { %v821_v15 = vadd.f32 %v1342_v14, %v2013_v41  ;;  %v896_v16 = vmax.f32 %v818_v12, 0.0 }
 0x2c2   :  { %v897_v17 = vmax.f32 %v821_v15, 0.0  ;;  %v1343_v18 = vpop.f32.mrb[36].mxu1 }
 0x2c3   :  { %v1344_v19 = vpop.f32.mrb[37].mxu1 }
 0x2c4   :  { %v1345_v20 = vadd.f32 %v1344_v19, %v1343_v18  ;;  %v1346_v21 = vpop.f32.mrb[38].mxu1  ;;  %v922_v22 = vpack.c.bf16 %v897_v17, %v896_v16 }
 0x2c5   :  { %v1347_v23 = vpop.f32.mrb[39].mxu1 }
 0x2c6   :  { %v826_v25 = vadd.f32 %v1345_v20, %v2013_v41  ;;  %v1348_v26 = vadd.f32 %v1347_v23, %v1346_v21  ;;  %1385 = vmatprep.subr.bf16.mxu0 %v922_v22 }
 0x2c7   :  { %1386 = vmatpush3.bf16.msra.mxu0 %v2021_v55 }
 0x2c8   :  { %v829_v27 = vadd.f32 %v1348_v26, %v2013_v41  ;;  %v898_v28 = vmax.f32 %v826_v25, 0.0 }
 0x2ca   :  { %v899_v29 = vmax.f32 %v829_v27, 0.0  ;;  %v1349_v30 = vpop.f32.mrb[40].mxu1 }
 0x2cb   :  { %v1350_v31 = vpop.f32.mrb[41].mxu1 }
 0x2cc   :  { %v1351_v32 = vadd.f32 %v1350_v31, %v1349_v30  ;;  %v1352_v33 = vpop.f32.mrb[42].mxu1  ;;  %v923_v34 = vpack.c.bf16 %v899_v29, %v898_v28 }
 0x2cd   :  { %v1353_v36 = vpop.f32.mrb[43].mxu1 }
 0x2ce   :  { %v834_v37 = vadd.f32 %v1351_v32, %v2013_v41  ;;  %v1354_v38 = vadd.f32 %v1353_v36, %v1352_v33  ;;  %1387 = vmatprep.subr.bf16.mxu0 %v923_v34 }
 0x2cf   :  { %1388 = vmatpush3.bf16.msra.mxu0 %v2025_v2 }
 0x2d0   :  { %v837_v39 = vadd.f32 %v1354_v38, %v2013_v41  ;;  %v900_v40 = vmax.f32 %v834_v37, 0.0  ;;  %v983_v38 = vld [vmem:[#allocation12] sm:$0xff] }
 0x2d2   :  { %v901_v55 = vmax.f32 %v837_v39, 0.0  ;;  %v1355_v42 = vpop.f32.mrb[44].mxu1  ;;  %v984_v39 = vld [vmem:[#allocation12 + $0x8] sm:$0xff] }
 0x2d3   :  { %v1356_v43 = vpop.f32.mrb[45].mxu1 }
 0x2d4   :  { %v1357_v44 = vadd.f32 %v1356_v43, %v1355_v42  ;;  %v1358_v45 = vpop.f32.mrb[46].mxu1  ;;  %v924_v46 = vpack.c.bf16 %v901_v55, %v900_v40  ;;  %v1245_v40 = vcombine.low %v2016_v48, %v2016_v48  ;;  %v1560_v55 = vpack.c.bf16 %v984_v39, %v983_v38  ;;  %v985_v43 = vld [vmem:[#allocation12 + $0x10] sm:$0xff] }
 0x2d5   :  { %v1359_v49 = vpop.f32.mrb[47].mxu1  ;;  %v1869_v42 = vmov 0.0|0.0   ;;  %v989_v48 = vld [vmem:[#allocation12 + $0x30] sm:$0xff] }
 0x2d6   :  { %v842_v50 = vadd.f32 %v1357_v44, %v2013_v41  ;;  %v1360_v51 = vadd.f32 %v1359_v49, %v1358_v45  ;;  %1389 = vmatprep.subr.bf16.mxu0 %v924_v46  ;;  %v986_v44 = vld [vmem:[#allocation12 + $0x18] sm:$0xff]  ;;  %v988_v45 = vld [vmem:[#allocation12 + $0x28] sm:$0xff] }
 0x2d7   :  { %1390 = vmatpush3.bf16.msra.mxu0 %v2029_v13  ;;  %v990_v49 = vld [vmem:[#allocation12 + $0x38] sm:$0xff] }
 0x2d8   :  { %v845_v52 = vadd.f32 %v1360_v51, %v2013_v41  ;;  %v902_v53 = vmax.f32 %v842_v50, 0.0  ;;  %v991_v50 = vld [vmem:[#allocation12 + $0x40] sm:$0xff]  ;;  %v992_v51 = vld [vmem:[#allocation12 + $0x48] sm:$0xff] }
 0x2da   :  { %v903_v2 = vmax.f32 %v845_v52, 0.0  ;;  %v1361_v54 = vpop.f32.mrb[48].mxu1  ;;  %v1572_v52 = vpack.c.bf16 %v992_v51, %v991_v50 }
 0x2db   :  { %v1362_v56 = vpop.f32.mrb[49].mxu1 }
 0x2dc   :  { %v1363_v57 = vadd.f32 %v1362_v56, %v1361_v54  ;;  %v1364_v58 = vpop.f32.mrb[50].mxu1  ;;  %v925_v59 = vpack.c.bf16 %v903_v2, %v902_v53  ;;  %v993_v53 = vld [vmem:[#allocation12 + $0x50] sm:$0xff]  ;;  %v994_v2 = vld [vmem:[#allocation12 + $0x58] sm:$0xff]  ;;  %v995_v56 = vld [vmem:[#allocation12 + $0x60] sm:$0xff] }
 0x2dd   :  { %v1365_v61 = vpop.f32.mrb[51].mxu1  ;;  %v1575_v54 = vpack.c.bf16 %v994_v2, %v993_v53 }
 0x2de   :  { %v850_v62 = vadd.f32 %v1363_v57, %v2013_v41  ;;  %v1366_v63 = vadd.f32 %v1365_v61, %v1364_v58  ;;  %1391 = vmatprep.subr.bf16.mxu0 %v925_v59  ;;  %v996_v57 = vld [vmem:[#allocation12 + $0x68] sm:$0xff]  ;;  %v997_v59 = vld [vmem:[#allocation12 + $0x70] sm:$0xff]  ;;  %v998_v61 = vld [vmem:[#allocation12 + $0x78] sm:$0xff] }
 0x2df   :  { %1392 = vmatpush3.bf16.msra.mxu0 %v2033_v24  ;;  %v1578_v58 = vpack.c.bf16 %v996_v57, %v995_v56 }
 0x2e0   :  { %v853_v0 = vadd.f32 %v1366_v63, %v2013_v41  ;;  %v904_v1 = vmax.f32 %v850_v62, 0.0  ;;  %v1581_v62 = vpack.c.bf16 %v998_v61, %v997_v59  ;;  %v1871_v63 = vmov 0.0  }
 0x2e2   :  { %v905_v13 = vmax.f32 %v853_v0, 0.0  ;;  %v1367_v3 = vpop.f32.mrb[52].mxu1  ;;  %v1076_v0 = vld [vmem:[#allocation13] sm:$0xff] }
 0x2e3   :  { %v1368_v4 = vpop.f32.mrb[53].mxu1 }
 0x2e4   :  { %v1369_v5 = vadd.f32 %v1368_v4, %v1367_v3  ;;  %v1370_v6 = vpop.f32.mrb[54].mxu1  ;;  %v926_v7 = vpack.c.bf16 %v905_v13, %v904_v1  ;;  %v1077_v1 = vld [vmem:[#allocation13 + $0x8] sm:$0xff] }
 0x2e5   :  { %v1371_v9 = vpop.f32.mrb[55].mxu1  ;;  %v1584_v4 = vpack.c.bf16 %v1077_v1, %v1076_v0 }
 0x2e6   :  { %v858_v10 = vadd.f32 %v1369_v5, %v2013_v41  ;;  %v1372_v11 = vadd.f32 %v1371_v9, %v1370_v6  ;;  %1393 = vmatprep.subr.bf16.mxu0 %v926_v7  ;;  %v1078_v7 = vld [vmem:[#allocation13 + $0x10] sm:$0xff]  ;;  %v1079_v9 = vld [vmem:[#allocation13 + $0x18] sm:$0xff] }
 0x2e7   :  { %1394 = vmatpush3.bf16.msra.mxu0 %v2037_v35 }
 0x2e8   :  { %v861_v12 = vadd.f32 %v1372_v11, %v2013_v41  ;;  %v906_v14 = vmax.f32 %v858_v10, 0.0  ;;  %v1587_v11 = vpack.c.bf16 %v1079_v9, %v1078_v7 }
 0x2ea   :  { %v907_v24 = vmax.f32 %v861_v12, 0.0  ;;  %v1373_v15 = vpop.f32.mrb[56].mxu1  ;;  %v1080_v12 = vld [vmem:[#allocation13 + $0x20] sm:$0xff] }
 0x2eb   :  { %v1374_v16 = vpop.f32.mrb[57].mxu1 }
 0x2ec   :  { %v1375_v17 = vadd.f32 %v1374_v16, %v1373_v15  ;;  %v1376_v18 = vpop.f32.mrb[58].mxu1  ;;  %v927_v19 = vpack.c.bf16 %v907_v24, %v906_v14  ;;  %v1081_v14 = vld [vmem:[#allocation13 + $0x28] sm:$0xff]  ;;  %v1082_v15 = vld [vmem:[#allocation13 + $0x30] sm:$0xff]  ;;  %v1083_v16 = vld [vmem:[#allocation13 + $0x38] sm:$0xff] }
 0x2ed   :  { %v1377_v20 = vpop.f32.mrb[59].mxu1  ;;  %v1590_v24 = vpack.c.bf16 %v1081_v14, %v1080_v12 }
 0x2ee   :  { %v866_v21 = vadd.f32 %v1375_v17, %v2013_v41  ;;  %v1378_v22 = vadd.f32 %v1377_v20, %v1376_v18  ;;  %1395 = vmatprep.subr.bf16.mxu0 %v927_v19  ;;  %v1593_v17 = vpack.c.bf16 %v1083_v16, %v1082_v15  ;;  %v1084_v18 = vld [vmem:[#allocation13 + $0x40] sm:$0xff]  ;;  %v1085_v19 = vld [vmem:[#allocation13 + $0x48] sm:$0xff] }
 0x2ef   :  { %1396 = vmatpush3.bf16.msra.mxu0 %v2041_v47  ;;  %v1596_v20 = vpack.c.bf16 %v1085_v19, %v1084_v18 }
 0x2f0   :  { %v869_v23 = vadd.f32 %v1378_v22, %v2013_v41  ;;  %v908_v25 = vmax.f32 %v866_v21, 0.0  ;;  %v1086_v21 = vld [vmem:[#allocation13 + $0x50] sm:$0xff]  ;;  %v1087_v22 = vld [vmem:[#allocation13 + $0x58] sm:$0xff] }
 0x2f2   :  { %v909_v35 = vmax.f32 %v869_v23, 0.0  ;;  %v1379_v26 = vpop.f32.mrb[60].mxu1  ;;  %v1599_v23 = vpack.c.bf16 %v1087_v22, %v1086_v21 }
 0x2f3   :  { %v1380_v27 = vpop.f32.mrb[61].mxu1 }
 0x2f4   :  { %v1381_v28 = vadd.f32 %v1380_v27, %v1379_v26  ;;  %v1382_v29 = vpop.f32.mrb[62].mxu1  ;;  %v928_v30 = vpack.c.bf16 %v909_v35, %v908_v25  ;;  %v1088_v25 = vld [vmem:[#allocation13 + $0x60] sm:$0xff]  ;;  %v1089_v35 = vld [vmem:[#allocation13 + $0x68] sm:$0xff]  ;;  %v1090_v27 = vld [vmem:[#allocation13 + $0x70] sm:$0xff] }
 0x2f5   :  { %v1383_v31 = vpop.f32.mrb[63].mxu1  ;;  %v1602_v26 = vpack.c.bf16 %v1089_v35, %v1088_v25 }
 0x2f6   :  { %v874_v32 = vadd.f32 %v1381_v28, %v2013_v41  ;;  %v1384_v33 = vadd.f32 %v1383_v31, %v1382_v29  ;;  %1397 = vmatprep.subr.bf16.mxu0 %v928_v30  ;;  %v1091_v28 = vld [vmem:[#allocation13 + $0x78] sm:$0xff] }
 0x2f7   :  { %1398 = vmatpush3.bf16.msra.mxu0 %v2045_v60  ;;  %v987_v60 = vld [vmem:[#allocation12 + $0x20] sm:$0xff]  ;;  %v1605_v29 = vpack.c.bf16 %v1091_v28, %v1090_v27  ;;  %v1247_v30 = vld [vmem:[%s2119_s6] ss:$0 sm:$0xff] }
 0x2f8   :  { %v877_v34 = vadd.f32 %v1384_v33, %v2013_v41  ;;  %v910_v36 = vmax.f32 %v874_v32, 0.0  ;;  %v1563_v41 = vpack.c.bf16 %v986_v44, %v985_v43  ;;  %v1566_v46 = vpack.c.bf16 %v988_v45, %v987_v60 }
 0x2fa   :  { %v911_v47 = vmax.f32 %v877_v34, 0.0  ;;  %v1248_v34 = vld [vmem:[%s2121_s8] ss:$0 sm:$0xff] }
 0x2fc   :  { %v929_v37 = vpack.c.bf16 %v911_v47, %v910_v36 }
 0x2fe   :  { %1399 = vmatprep.subr.bf16.mxu0 %v929_v37 }
 0x2ff   :  { %1400 = vmatpush3.bf16.msra.mxu0 %v2049_v8  ;;  %v1569_v8 = vpack.c.bf16 %v990_v49, %v989_v48 }
 0x300   :  { %1559 = vmatprep.subr.bf16.mxu0 %v1869_v42 }
 0x302   :  { %970 = vmatmul.mubr.bf16.vlgmr.msra.gmra.mrb[32].mxu0 %v1245_v40 }
 0x303   :  { %1561 = vmatpush3.bf16.msra.mxu0 %v1560_v55  ;;  %1521 = vmatprep.mubr.msk.f32.mxu0 %vm1870_vm0, %v1871_v63 }
 0x304   :  { %1562 = vmatprep.subr.bf16.mxu0 %v1869_v42 }
 0x307   :  { %1564 = vmatpush3.bf16.msra.mxu0 %v1563_v41 }
 0x308   :  { %1565 = vmatprep.subr.bf16.mxu0 %v1869_v42 }
 0x30b   :  { %1567 = vmatpush3.bf16.msra.mxu0 %v1566_v46 }
 0x30c   :  { %1568 = vmatprep.subr.bf16.mxu0 %v1869_v42 }
 0x30f   :  { %1570 = vmatpush3.bf16.msra.mxu0 %v1569_v8 }
 0x310   :  { %1571 = vmatprep.subr.bf16.mxu0 %v1869_v42 }
 0x313   :  { %1573 = vmatpush3.bf16.msra.mxu0 %v1572_v52 }
 0x314   :  { %1574 = vmatprep.subr.bf16.mxu0 %v1869_v42 }
 0x317   :  { %1576 = vmatpush3.bf16.msra.mxu0 %v1575_v54 }
 0x318   :  { %1577 = vmatprep.subr.bf16.mxu0 %v1869_v42 }
 0x31b   :  { %1579 = vmatpush3.bf16.msra.mxu0 %v1578_v58 }
 0x31c   :  { %1580 = vmatprep.subr.bf16.mxu0 %v1869_v42 }
 0x31f   :  { %1582 = vmatpush3.bf16.msra.mxu0 %v1581_v62 }
 0x320   :  { %1583 = vmatprep.subr.bf16.mxu0 %v1869_v42 }
 0x3d5   :  { %v1401_v13 = vpop.f32.mrb[32].mxu0 }
 0x3d6   :  { %v1402_v3 = vpop.f32.mrb[33].mxu0 }
 0x3d7   :  { %v1403_v5 = vadd.f32 %v1402_v3, %v1401_v13  ;;  %v1404_v6 = vpop.f32.mrb[34].mxu0 }
 0x3d8   :  { %v1405_v10 = vpop.f32.mrb[35].mxu0 }
 0x3d9   :  { %1522 = vmatmul.mubr.f32.vlgmr.msra.gmra.mrb[36].mxu0 %v1403_v5 }
 0x3da   :  { %1585 = vmatpush3.bf16.msra.mxu0 %v1584_v4  ;;  %1556 = vmatprep.mubr.msk.f32.mxu0 %vm1870_vm0, %v1871_v63 }
 0x3db   :  { %1586 = vmatprep.subr.bf16.mxu0 %v1869_v42 }
 0x3de   :  { %1588 = vmatpush3.bf16.msra.mxu0 %v1587_v11 }
 0x3df   :  { %1589 = vmatprep.subr.bf16.mxu0 %v1869_v42 }
 0x3e2   :  { %1591 = vmatpush3.bf16.msra.mxu0 %v1590_v24 }
 0x3e3   :  { %1592 = vmatprep.subr.bf16.mxu0 %v1869_v42 }
 0x3e6   :  { %1594 = vmatpush3.bf16.msra.mxu0 %v1593_v17 }
 0x3e7   :  { %1595 = vmatprep.subr.bf16.mxu0 %v1869_v42 }
 0x3ea   :  { %1597 = vmatpush3.bf16.msra.mxu0 %v1596_v20 }
 0x3eb   :  { %1598 = vmatprep.subr.bf16.mxu0 %v1869_v42 }
 0x3ee   :  { %1600 = vmatpush3.bf16.msra.mxu0 %v1599_v23 }
 0x3ef   :  { %1601 = vmatprep.subr.bf16.mxu0 %v1869_v42 }
 0x3f2   :  { %1603 = vmatpush3.bf16.msra.mxu0 %v1602_v26 }
 0x3f3   :  { %1604 = vmatprep.subr.bf16.mxu0 %v1869_v42 }
 0x3f6   :  { %1606 = vmatpush3.bf16.msra.mxu0 %v1605_v29 }
 0x4ac   :  { %v1072_v31 = vpop.f32.mrb[36].mxu0 }
 0x4ad   :  { %v1073_v32 = vadd.f32 %v1247_v30, %v1072_v31  ;;  %v1523_v33 = vpop.f32.mrb[37].mxu0 }
 0x4af   :  { %1557 = vmatmul.mubr.f32.vlgmr.msra.gmra.mrb[38].mxu0 %v1073_v32 }
 0x582   :  { %v1165_v36 = vpop.f32.mrb[38].mxu0 }
 0x583   :  { %v1166_v47 = vadd.f32 %v1248_v34, %v1165_v36  ;;  %v1558_v37 = vpop.f32.mrb[39].mxu0 }
 0x585   :  { %1169 = vst [vmem:[#allocation15] sm:$0xff] %v1166_v47 }
 0x586   :  { %1838 = shalt.err (!%p1835_p10)
}
 0x587   :  { %s1839_s25 = scalar_lea.hbm %s2122_s9, 128 }
 0x588   :  { %p1840_p11 = scmp.ne.s32.totalorder %s2122_s9, %s1839_s25  ;;  %p1843_p12 = scmp.lt.u32.totalorder %s1839_s25, %s2122_s9 }
 0x58a   :  { %p1845_p13 = pnand %p1843_p12, %p1840_p11 }
 0x58c   :  { %1848 = shalt.err (!%p1845_p13)
}
 0x58d   :  { %1179 = dma.vmem_to_hbm [thread:$0]  %s1177_s20, 128, %s2122_s9, [#allocation6]  }
 0x58e   :  { %1857 = dma.done.wait [#allocation6], 128  }
 0x58f   :  { %1858 = vsyncadd [#allocation6], 4294967168 }
 0x590   :  { %1183 = vsyncpa [#allocation5], 1 }
 0x591   :  { %1184 = vsyncpa [#allocation8], 1 }
 0x592   :  { %1185 = vsyncpa [#allocation11], 1 }
 0x593   :  { %1186 = vsyncpa [#allocation14], 1 }
 0x594   :  { %1187 = vsyncpa [#allocation6], 1 }

</bundles_post_ra>
